<compile_context>
chip_gen: v6e
topology: v6e:2x2x1
jax: 0.10.0
libtpu: 0.0.40
codegen_flags: <defaults>
</compile_context>

<pallas_src>
import functools

import jax
import jax.numpy as jnp
from jax import lax
from jax.experimental import pallas as pl
from jax.experimental.pallas import tpu as pltpu

_EPS = 1e-8  # torch cosine_similarity default eps


def _gauss_sim_kernel(b_ref, x_ref, o_ref, *, w_size, t_total, n_b, num_slabs,
                      inv_two_sigma_sq):
    # b_ref: SMEM (2*n_b,) f32 -- per-slab boundary values:
    #        b_ref[gs]       = sum_c x[c, gs*W] * x[c, gs*W - 1]   (0 for gs == 0)
    #        b_ref[n_b + gs] = sum_c x[c, gs*W - 1]^2              (1 for gs == 0)
    # x_ref: VMEM (C, TB) current time tile
    # o_ref: VMEM (1, TB) gaussian-smoothed similarity for this tile
    i = pl.program_id(0)
    C, TB = x_ref.shape
    W = w_size
    n_c8, c_rem = divmod(C, 8)

    col = lax.broadcasted_iota(jnp.int32, (1, W), 1)
    col0 = col == 0
    eps_sq = jnp.float32(_EPS * _EPS)

    # Static loop over lane slabs: keeps the vreg working set bounded (~16 vregs)
    # independently of the (large) DMA tile TB.  num_slabs = TB // W <= 16.
    for s in range(num_slabs):
        lane0 = s * W  # static, multiple of 128

        def chan_body(k, carry, lane0=lane0):
            dot8, ssq8 = carry
            c0 = pl.multiple_of(k * 8, 8)
            xc = x_ref[pl.ds(c0, 8), pl.ds(lane0, W)].astype(jnp.float32)
            xp = pltpu.roll(xc, shift=1, axis=1)          # xp[:, j] = xc[:, j-1]
            return dot8 + xc * xp, ssq8 + xc * xc         # packed (8, W) partials

        if n_c8 > 0:
            zero8 = jnp.zeros((8, W), jnp.float32)
            dot8, ssq8 = lax.fori_loop(0, n_c8, chan_body, (zero8, zero8),
                                       unroll=min(2, n_c8))
            dot = jnp.sum(dot8, axis=0, keepdims=True)    # single deferred reduce
            ssq = jnp.sum(ssq8, axis=0, keepdims=True)
        else:
            dot = jnp.zeros((1, W), jnp.float32)
            ssq = jnp.zeros((1, W), jnp.float32)

        if c_rem:  # channels not a multiple of 8: one extra partial chunk
            xr = x_ref[pl.ds(n_c8 * 8, c_rem), pl.ds(lane0, W)].astype(jnp.float32)
            xrp = pltpu.roll(xr, shift=1, axis=1)
            dot = dot + jnp.sum(xr * xrp, axis=0, keepdims=True)
            ssq = ssq + jnp.sum(xr * xr, axis=0, keepdims=True)

        # Shifted squared norm = roll of the already-reduced row; fix column 0 of
        # the slab (its t-1 lives in the previous slab / previous tile) with the
        # precomputed SMEM boundary scalars.  gs == 0 encodes the prepended 1.0.
        gs = i * num_slabs + s
        bdot = b_ref[gs]
        bssq = b_ref[n_b + gs]
        ssq_prev = pltpu.roll(ssq, shift=1, axis=1)
        dot = jnp.where(col0, bdot, dot)
        ssq_prev = jnp.where(col0, bssq, ssq_prev)

        # torch cosine_similarity: dot / sqrt(max(ssq * ssq_prev, eps^2))
        sim = dot * lax.rsqrt(jnp.maximum(ssq * ssq_prev, eps_sq))

        # Ragged tail: lanes with global t >= T are discarded by the masked store
        # anyway, but zero them so no NaN/Inf flows through exp.
        t_idx = i * TB + lane0 + col
        sim = jnp.where(t_idx < t_total, sim, 0.0)

        o_ref[:, lane0:lane0 + W] = jnp.exp(-(sim * sim) * inv_two_sigma_sq)


def _vmem_capacity_bytes():
    try:
        cap = getattr(pltpu.get_tpu_info(), "vmem_capacity_bytes", None)
        if cap:
            return int(cap)
    except Exception:
        pass
    return 64 * 1024 * 1024  # conservative fallback (v7x per-TensorCore VMEM)


def _choose_tiles(C, T, itemsize):
    """Generation-aware DMA tile TB (multiple of the compute slab W)."""
    cap = _vmem_capacity_bytes()
    # Double-buffered (C, TB) input gets ~1/4 of physical VMEM; leaves headroom
    # for the output double-buffer and compiler scratch on v7x's 64 MiB.
    in_budget = max(2 * 1024 * 1024, cap // 4)
    tb_cap = (in_budget // (2 * max(C, 1) * itemsize)) // 128 * 128
    t128 = ((T + 127) // 128) * 128
    tb = max(128, min(8192, tb_cap, t128))
    w = min(512, tb)                 # compute slab: bounded vreg working set
    tb = max(w, (tb // w) * w)       # TB is a multiple of W
    return tb, w, cap


def _boundary_values(x2d, T, w, n_b):
    """Per-slab boundary scalars: [bdot(0..n_b-1), bssq(0..n_b-1)] as one f32 row."""
    s = jnp.arange(n_b, dtype=jnp.int32)
    cur = jnp.minimum(s * w, T - 1)          # clamp padded slabs (masked in-kernel)
    prv = jnp.maximum(cur - 1, 0)
    xa = jnp.take(x2d, cur, axis=1).astype(jnp.float32)   # (C, n_b) -- tiny gather
    xb = jnp.take(x2d, prv, axis=1).astype(jnp.float32)
    bdot = jnp.sum(xa * xb, axis=0)
    bssq = jnp.sum(xb * xb, axis=0)
    bdot = bdot.at[0].set(0.0)   # global t == 0: forces sim = 0 -> exp(0) = 1.0
    bssq = bssq.at[0].set(1.0)
    return jnp.concatenate([bdot, bssq], axis=0)           # (2 * n_b,) f32


def gaussian_smoothed_similarity(x, sigma=1.0, *, tb=None, slab=None):
    """x: (1, C, T) -> (1, 1, T), matching the PyTorch module (batch must be 1)."""
    assert x.ndim == 3 and x.shape[0] == 1, "module semantics require batch == 1"
    _, C, T = x.shape
    x2d = x[0]                                   # (C, T); dtype preserved (bf16 OK)
    itemsize = jnp.dtype(x2d.dtype).itemsize

    tb_auto, _, cap = _choose_tiles(C, T, itemsize)
    if tb is None:
        tb = tb_auto
    if slab is None:
        slab = min(512, tb)
        while tb % slab:
            slab -= 128
    assert tb % 128 == 0 and slab % 128 == 0 and tb % slab == 0

    grid_t = pl.cdiv(T, tb)          # no wrapper pad: ragged last tile is masked
    num_slabs = tb // slab
    n_b = grid_t * num_slabs

    bvals = _boundary_values(x2d, T, slab, n_b)

    need = 2 * C * tb * itemsize + 2 * tb * 4
    vmem_limit = int(min(cap * 0.85, max(32 * 1024 * 1024, need + 8 * 1024 * 1024)))

    kernel = functools.partial(
        _gauss_sim_kernel, w_size=slab, t_total=T, n_b=n_b, num_slabs=num_slabs,
        inv_two_sigma_sq=1.0 / (2.0 * float(sigma) ** 2))

    out = pl.pallas_call(
        kernel,
        out_shape=jax.ShapeDtypeStruct((1, T), jnp.float32),
        grid=(grid_t,),
        in_specs=[
            pl.BlockSpec(memory_space=pltpu.MemorySpace.SMEM),   # boundary scalars
            pl.BlockSpec((C, tb), lambda i: (0, i)),             # time tile
        ],
        out_specs=pl.BlockSpec((1, tb), lambda i: (0, i)),       # lane-dense output
        compiler_params=pltpu.CompilerParams(
            dimension_semantics=("parallel",),
            vmem_limit_bytes=vmem_limit),
    )(bvals, x2d)

    return out.reshape(1, 1, T)


def _reference(x, sigma=1.0):
    # Pure-JAX replica of the PyTorch forward (torch eps semantics), for checking.
    a = x[:, :, 1:].astype(jnp.float32)
    b = x[:, :, :-1].astype(jnp.float32)
    w12 = jnp.sum(a * b, axis=1)
    w1 = jnp.sum(a * a, axis=1)
    w2 = jnp.sum(b * b, axis=1)
    sim = w12 / jnp.sqrt(jnp.maximum(w1 * w2, _EPS * _EPS))
    gauss = jnp.exp(-(sim ** 2) / (2.0 * sigma ** 2))
    out = jnp.concatenate([jnp.ones((1, 1), gauss.dtype), gauss], axis=-1)
    return out[:, None, :]


if __name__ == "__main__":
    k1, k2, k3 = jax.random.split(jax.random.PRNGKey(0), 3)

    # Case 1: tiny shape, C < 8 (remainder-only channel path), single tile/slab.
    x1 = jax.random.normal(k1, (1, 4, 16), dtype=jnp.float32)
    o1 = jax.block_until_ready(gaussian_smoothed_similarity(x1, sigma=1.0))
    r1 = _reference(x1, sigma=1.0)
    assert o1.shape == (1, 1, 16), o1.shape
    assert jnp.allclose(o1, r1, atol=1e-5, rtol=1e-5)

    # Case 2: multi-tile + multi-slab + ragged tail + channel remainder (C=20).
    x2 = jax.random.normal(k2, (1, 20, 300), dtype=jnp.float32)
    o2 = jax.block_until_ready(
        gaussian_smoothed_similarity(x2, sigma=0.7, tb=256, slab=128))
    r2 = _reference(x2, sigma=0.7)
    assert o2.shape == (1, 1, 300), o2.shape
    assert jnp.allclose(o2, r2, atol=1e-5, rtol=1e-5)

    # Case 3: auto tiling, C a multiple of 8 (partially-unrolled channel loop).
    x3 = jax.random.normal(k3, (1, 32, 200), dtype=jnp.float32)
    o3 = jax.block_until_ready(gaussian_smoothed_similarity(x3, sigma=1.3))
    r3 = _reference(x3, sigma=1.3)
    assert o3.shape == (1, 1, 200), o3.shape
    assert jnp.allclose(o3, r3, atol=1e-5, rtol=1e-5)

    print("KERNEL_OK")
</pallas_src>

<mosaic_0001>
module attributes {stable_mosaic.version = 11 : i64} {
  func.func @_gauss_sim_kernel(%arg0: i32, %arg1: memref<2xf32, #tpu.memory_space<smem>>, %arg2: memref<4x128xf32, #tpu.memory_space<vmem>>, %arg3: memref<1x128xf32, #tpu.memory_space<vmem>>) attributes {dimension_semantics = [#tpu.dimension_semantics<parallel>], iteration_bounds = array<i64: 1>, scalar_prefetch = 0 : i64, scratch_operands = 0 : i64, tpu.core_type = #tpu.core_type<tc>, window_params = [{transform_indices = @transform_0, window_bounds = array<i64: 2>}, {transform_indices = @transform_1, window_bounds = array<i64: 4, 128>}, {transform_indices = @transform_2, window_bounds = array<i64: 1, 128>}]} {
    %0 = tpu.iota {dimensions = array<i32: 1>} : vector<1x128xi32>
    %c0_i32 = arith.constant 0 : i32
    %1 = vector.broadcast %c0_i32 : i32 to vector<1x128xi32>
    %2 = arith.cmpi eq, %0, %1 : vector<1x128xi32>
    %cst = arith.constant 0.000000e+00 : f32
    %3 = vector.broadcast %cst : f32 to vector<1x128xf32>
    %cst_0 = arith.constant 0.000000e+00 : f32
    %4 = vector.broadcast %cst_0 : f32 to vector<1x128xf32>
    %c0 = arith.constant 0 : index
    %c0_1 = arith.constant 0 : index
    %5 = vector.load %arg2[%c0, %c0_1] : memref<4x128xf32, #tpu.memory_space<vmem>>, vector<4x128xf32>
    %c1_i32 = arith.constant 1 : i32
    %6 = tpu.dynamic_rotate %5 by %c1_i32 dim 1 : vector<4x128xf32>, i32 -> vector<4x128xf32>
    %7 = arith.mulf %5, %6 : vector<4x128xf32>
    %cst_2 = arith.constant dense<0.000000e+00> : vector<128xf32>
    %8 = vector.multi_reduction <add>, %7, %cst_2 [0] : vector<4x128xf32> to vector<128xf32>
    %9 = vector.shape_cast %8 : vector<128xf32> to vector<1x128xf32>
    %10 = arith.addf %3, %9 : vector<1x128xf32>
    %11 = arith.mulf %5, %5 : vector<4x128xf32>
    %cst_3 = arith.constant dense<0.000000e+00> : vector<128xf32>
    %12 = vector.multi_reduction <add>, %11, %cst_3 [0] : vector<4x128xf32> to vector<128xf32>
    %13 = vector.shape_cast %12 : vector<128xf32> to vector<1x128xf32>
    %14 = arith.addf %4, %13 : vector<1x128xf32>
    %c1_i32_4 = arith.constant 1 : i32
    %15 = arith.muli %arg0, %c1_i32_4 : i32
    %c0_i32_5 = arith.constant 0 : i32
    %16 = arith.addi %15, %c0_i32_5 : i32
    %17 = arith.index_cast %16 : i32 to index
    %18 = memref.load %arg1[%17] : memref<2xf32, #tpu.memory_space<smem>>
    %c1_i32_6 = arith.constant 1 : i32
    %19 = arith.addi %c1_i32_6, %16 : i32
    %20 = arith.index_cast %19 : i32 to index
    %21 = memref.load %arg1[%20] : memref<2xf32, #tpu.memory_space<smem>>
    %c1_i32_7 = arith.constant 1 : i32
    %22 = tpu.dynamic_rotate %14 by %c1_i32_7 dim 1 : vector<1x128xf32>, i32 -> vector<1x128xf32>
    %23 = vector.broadcast %18 : f32 to vector<1x128xf32>
    %24 = arith.select %2, %23, %10 : vector<1x128xi1>, vector<1x128xf32>
    %25 = vector.broadcast %21 : f32 to vector<1x128xf32>
    %26 = arith.select %2, %25, %22 : vector<1x128xi1>, vector<1x128xf32>
    %27 = arith.mulf %14, %26 : vector<1x128xf32>
    %cst_8 = arith.constant 1.000000e-16 : f32
    %28 = vector.broadcast %cst_8 : f32 to vector<1x128xf32>
    %29 = arith.maximumf %27, %28 : vector<1x128xf32>
    %30 = math.rsqrt %29 : vector<1x128xf32>
    %31 = arith.mulf %24, %30 : vector<1x128xf32>
    %c128_i32 = arith.constant 128 : i32
    %32 = arith.muli %arg0, %c128_i32 : i32
    %c0_i32_9 = arith.constant 0 : i32
    %33 = arith.addi %32, %c0_i32_9 : i32
    %34 = vector.broadcast %33 : i32 to vector<1x128xi32>
    %35 = arith.addi %34, %0 : vector<1x128xi32>
    %c16_i32 = arith.constant 16 : i32
    %36 = vector.broadcast %c16_i32 : i32 to vector<1x128xi32>
    %37 = arith.cmpi slt, %35, %36 : vector<1x128xi32>
    %cst_10 = arith.constant 0.000000e+00 : f32
    %38 = vector.broadcast %cst_10 : f32 to vector<1x128xf32>
    %39 = arith.select %37, %31, %38 : vector<1x128xi1>, vector<1x128xf32>
    %40 = arith.mulf %39, %39 : vector<1x128xf32>
    %cst_11 = arith.constant 0.000000e+00 : f32
    %41 = vector.broadcast %cst_11 : f32 to vector<1x128xf32>
    %42 = arith.subf %41, %40 : vector<1x128xf32>
    %cst_12 = arith.constant 5.000000e-01 : f32
    %43 = vector.broadcast %cst_12 : f32 to vector<1x128xf32>
    %44 = arith.mulf %42, %43 : vector<1x128xf32>
    %45 = math.exp %44 : vector<1x128xf32>
    %c0_13 = arith.constant 0 : index
    %c0_14 = arith.constant 0 : index
    %46 = vector.load %arg3[%c0_13, %c0_14] : memref<1x128xf32, #tpu.memory_space<vmem>>, vector<1x128xf32>
    tpu.vector_store %arg3[%c0_13, %c0_14], %45 {strides = array<i32>} : memref<1x128xf32, #tpu.memory_space<vmem>>, vector<1x128xf32>,
    return
  }
  func.func @transform_0(%arg0: i32) -> i32 {
    %c0_i32 = arith.constant 0 : i32
    %c0_i32_0 = arith.constant 0 : i32
    return %c0_i32 : i32
  }
  func.func @transform_1(%arg0: i32) -> (i32, i32) {
    %c0_i32 = arith.constant 0 : i32
    %c0_i32_0 = arith.constant 0 : i32
    return %c0_i32, %arg0 : i32, i32
  }
  func.func @transform_2(%arg0: i32) -> (i32, i32) {
    %c0_i32 = arith.constant 0 : i32
    %c0_i32_0 = arith.constant 0 : i32
    return %c0_i32, %arg0 : i32, i32
  }
}

</mosaic_0001>

<bundles_post_ra>
// kernel: tpu_custom_call.1
= control target key start
LH: loop header
LB: loop body
LE: loop exit
PB: predicated region body
PF: predicated region fallthrough
CT: control target
= control target key end

     0   :  { %7 = vsyncpa [#allocation5], 0  ;;  %s195_s0 = inlined_call_operand.hbm [shape: f32[2], index: 0, kind: input, shape index: {}]   ;;  %s196_s1 = inlined_call_operand.hbm [shape: f32[4,16], index: 1, kind: input, shape index: {}]   ;;  %s197_s2 = inlined_call_operand.hbm [shape: f32[1,16], index: 2, kind: output, shape index: {}]  }
   0x1   :  { %8 = vsyncpa [#allocation3], 0 }
   0x2   :  { %9 = vsyncpa [#allocation4], 0  ;;  %s163_s9 = smov [#allocation2]   ;;  %s164_s12 = smov [#allocation6]  }
   0x3   :  { %17 = dma.hbm_to_smem %s195_s0, 16, %s163_s9, [#allocation5]  }
   0x4   :  { %s24_s13 = sshll.u32 %s164_s12, 4  ;;  %s25_s13 = int_to_ptr.vmem [resolvable:$true] %s24_s13 }
   0x5   :  { %s125_s14 = scalar_lea.vmem %s25_s13, 64  ;;  %p130_p1 = scmp.lt.s32.totalorder %s25_s13, %s25_s13 }
   0x6   :  { %p126_p0 = scmp.ne.s32.totalorder %s25_s13, %s125_s14  ;;  %p131_p2 = scmp.lt.s32.totalorder %s125_s14, %s125_s14 }
   0x8   :  { %p132_p3 = por %p131_p2, %p130_p1 }
   0xa   :  { %p133_p4 = pnand %p132_p3, %p126_p0 }
   0xc   :  { %136 = shalt.err (!%p133_p4)
}
   0xd   :  { %27 = dma.hbm_to_vmem [thread:$0]  %s196_s1, 64, %s25_s13, [#allocation3]  }
   0xe   :  { %157 = dma.done.wait [#allocation5], 16  }
   0xf   :  { %158 = vsyncadd [#allocation5], 4294967280 }
  0x10   :  { %159 = dma.done.wait [#allocation3], 64  }
  0x11   :  { %160 = vsyncadd [#allocation3], 4294967232 }
  0x12   :  { %34 = sfence }
  0x13   :  { %v38_v0 = vld [vmem:[#allocation6] sm:$0xf]  ;;  %vm42_vm0 = vcmask 1043456   ;;  %s165_s0 = smov 1   ;;  %s100_s1 = sld [smem:[#allocation2 + $0x1]]  ;;  %v35_v9 = vlaneseq }
  0x14   :  { %v51_v1 = vmul.f32 %v38_v0, %v38_v0  ;;  %s60_s17 = sld [smem:[#allocation2]]  ;;  %s166_s18 = smov [#allocation7]  }
  0x15   :  { %v36_v10 = vand.u32 127, %v35_v9  ;;  %s90_s19 = sshll.u32 %s166_s18, 4  ;;  %s91_s19 = int_to_ptr.vmem [resolvable:$true] %s90_s19 }
  0x16   :  { %v52_v2 = vsel %vm42_vm0, %v51_v1, 0.0  ;;  %s137_s20 = scalar_lea.vmem %s91_s19, 16  ;;  %s141_s21 = scalar_lea.vmem %s91_s19, 32 }
  0x17   :  { %v53_v3 = vrot.slane %v52_v2, 4  ;;  %vm37_vm1 = vcmp.eq.s32.totalorder %v36_v10, 0  ;;  %vm76_vm2 = vcmp.lt.s32.totalorder %v36_v10, 16  ;;  %p138_p5 = scmp.ne.s32.totalorder %s91_s19, %s137_s20  ;;  %p142_p6 = scmp.lt.s32.totalorder %s91_s19, %s91_s19 }
  0x18   :  { %p143_p7 = scmp.lt.s32.totalorder %s141_s21, %s137_s20 }
  0x19   :  { %v54_v4 = vadd.f32 %v53_v3, %v52_v2  ;;  %v67_v11 = vstv %s100_s1 }
  0x1a   :  { %v65_v24 = vstv %s60_s17  ;;  %p144_p8 = por %p143_p7, %p142_p6 }
  0x1b   :  { %v55_v5 = vrot.slane %v54_v4, 2 }
  0x1c   :  { %p145_p9 = pnand %p144_p8, %p138_p5 }
  0x1d   :  { %v56_v6 = vadd.f32 %v55_v5, %v54_v4 }
  0x1f   :  { %v57_v7 = vrot.slane %v56_v6, 1 }
  0x21   :  { %v58_v8 = vadd.f32 %v57_v7, %v56_v6 }
  0x23   :  { %63 = vrot.lane.b32.xlu0 %v58_v8, %s165_s0 }
  0x27   :  { %39 = vrot.lane.b32.xlu0 %v38_v0, %s165_s0 }
  0x95   :  { %v64_v12 = vpop.permute.xlu0 %63 }
  0x96   :  { %v68_v13 = vsel %vm37_vm1, %v67_v11, %v64_v12 }
  0x97   :  { %v69_v14 = vmul.f32 %v68_v13, %v58_v8 }
  0x99   :  { %v70_v15 = vmax.f32 %v69_v14, 1e-16  ;;  %v40_v16 = vpop.permute.xlu0 %39 }
  0x9a   :  { %v41_v17 = vmul.f32 %v40_v16, %v38_v0 }
  0x9b   :  { %105 = vrsqrt.f32 %v70_v15 }
  0x9c   :  { %v43_v18 = vsel %vm42_vm0, %v41_v17, 0.0 }
  0x9d   :  { %v44_v19 = vrot.slane %v43_v18, 4 }
  0x9f   :  { %v45_v20 = vadd.f32 %v44_v19, %v43_v18 }
  0xa1   :  { %v46_v21 = vrot.slane %v45_v20, 2 }
  0xa3   :  { %v47_v22 = vadd.f32 %v46_v21, %v45_v20 }
  0xa5   :  { %v48_v23 = vrot.slane %v47_v22, 1 }
  0xa7   :  { %v49_v25 = vadd.f32 %v48_v23, %v47_v22 }
  0xa8   :  { %v106_v26 = vpop.eup %105 }
  0xa9   :  { %v66_v27 = vsel %vm37_vm1, %v65_v24, %v49_v25 }
  0xaa   :  { %v72_v28 = vmul.f32 %v106_v26, %v66_v27 }
  0xac   :  { %v77_v29 = vsel %vm76_vm2, %v72_v28, 0.0 }
  0xad   :  { %v78_v30 = vmul.f32 %v77_v29, %v77_v29 }
  0xaf   :  { %v79_v31 = vsub.f32 0.0, %v78_v30 }
  0xb1   :  { %v80_v32 = vmul.f32 0.5, %v79_v31 }
  0xb3   :  { %v81_v33 = vmul.f32 1.442695, %v80_v32 }
  0xb5   :  { %107 = vpow2.f32 %v81_v33 }
  0xc2   :  { %v108_v34 = vpop.eup %107 }
  0xc3   :  { %83 = vst [vmem:[#allocation7] sm:$0x1] %v108_v34 }
  0xc4   :  { %148 = shalt.err (!%p145_p9)
}
  0xc5   :  { %93 = dma.vmem_to_hbm [thread:$0]  %s91_s19, 16, %s197_s2, [#allocation4]  }
  0xc6   :  { %161 = dma.done.wait [#allocation4], 16  }
  0xc7   :  { %162 = vsyncadd [#allocation4], 4294967280 }
  0xc8   :  { %97 = vsyncpa [#allocation3], 1 }
  0xc9   :  { %98 = vsyncpa [#allocation4], 1 }
  0xca   :  { %99 = vsyncpa [#allocation5], 1 }

</bundles_post_ra>
